<compile_context>
chip_gen: v7x
topology: tpu7x:2x2x1
jax: 0.10.0
libtpu: 0.0.40
codegen_flags: <defaults>
</compile_context>

<pallas_src>
import functools

import jax
import jax.numpy as jnp
from jax.experimental import pallas as pl
from jax.experimental.pallas import tpu as pltpu


def _attention_kernel(enc_ref, tbase_ref, wv_ref, we_ref, g_ref, attn_ref):
    # enc_ref:   (Bb, N, C) bf16   tbase_ref: (N, C) bf16
    # wv_ref:    (C, C)  bf16      we_ref:    (C, T) bf16
    # g_ref:     (Bb, T, C) f32    attn_ref:  (Bb, T, N) f32
    bb, n, c = enc_ref.shape
    t_len = we_ref.shape[1]

    x_bf = enc_ref[...]                                # (Bb, N, C) bf16

    # v = enc @ Wv^T  (bias bv folded into tbase).  Batches flattened into the
    # M dim (M = Bb*N) so the MXU pipeline stays full across the whole block.
    v = jnp.dot(x_bf.reshape(bb * n, c), wv_ref[...],
                preferred_element_type=jnp.float32).reshape(bb, n, c)

    # Keep the big (Bb, N, C) intermediate in bf16: halves vreg/VMEM spill
    # traffic.  tanh runs natively in bf16 on v6e/v7x EUP (lowered via f32 on
    # v5e, where the win comes from the bf16 MXU inputs / reduced spills).
    t_bf = jnp.tanh(v.astype(jnp.bfloat16) + tbase_ref[...])

    # Logits over the T reading-order positions (be dropped: it cancels in the
    # softmax over N below).
    a = jnp.dot(t_bf.reshape(bb * n, c), we_ref[...],
                preferred_element_type=jnp.float32).reshape(bb, n, t_len)

    # Transpose to (Bb, T, N) BEFORE the softmax: reduction along the lane
    # axis, temporaries are lane-dense (N=256 lanes instead of T=25 lanes).
    a_t = jnp.transpose(a, (0, 2, 1))                  # (Bb, T, N) f32
    m = jnp.max(a_t, axis=-1, keepdims=True)
    e = jnp.exp(a_t - m)
    s = jnp.sum(e, axis=-1, keepdims=True)
    attn = e * pl.reciprocal(s, approx=False)          # exact: rows sum to 1

    # g = attn @ enc  (batched), bf16 operands, f32 accumulation.
    g = jnp.einsum("btn,bnc->btc", attn.astype(jnp.bfloat16), x_bf,
                   preferred_element_type=jnp.float32)

    g_ref[...] = g.astype(g_ref.dtype)
    attn_ref[...] = attn.astype(attn_ref.dtype)


def _pick_block_b(batch, requested):
    """Batches per grid step.  Keeps the grid >= 2 so the parallel batch axis
    still shards across v7x's two TensorCores, while amortizing the ~0.35 us
    per-grid-step pipeline overhead (cap 8; VMEM stays far under limits)."""
    if requested is not None:
        assert batch % requested == 0
        return requested
    cap = max(1, min(8, batch // 2))
    for bb in range(cap, 0, -1):
        if batch % bb == 0:
            return bb
    return 1


def attention_forward(enc_output_nchw, params, block_b=None):
    """enc_output_nchw: (B, C, H, W) float32.  Returns (g_output, attn4d)."""
    B, C, H, W = enc_output_nchw.shape
    N = H * W
    T = params["emb"].shape[0]            # max_length
    assert N == 256, "attn.view(..., 8, 32) in the original module needs H*W == 256"
    bb = _pick_block_b(B, block_b)

    # ----- glue: layout + batch-independent parameter folding -----
    # (B, C, H, W) -> (B, H, W, C) -> (B, N, C); cast to bf16 in the same XLA
    # fusion so the kernel streams half the HBM bytes per batch.
    enc_bf = jnp.transpose(enc_output_nchw, (0, 2, 3, 1)) \
                .reshape(B, N, C).astype(jnp.bfloat16)

    E = params["emb"]                     # (T, C)
    W0, b0 = params["w0_w"], params["w0_b"]   # (N, T), (N,)
    Wv, bv = params["wv_w"], params["wv_b"]   # (C, C), (C,)
    We = params["we_w"]                        # (T, C)   (we_b dropped on purpose)

    # tbase = W0 @ E + b0[:, None] + bv  (batch independent), stored bf16.
    tbase = (W0 @ E + b0[:, None] + bv[None, :]).astype(jnp.bfloat16)   # (N, C)
    wv_mat = Wv.T.astype(jnp.bfloat16)                                  # (C, C)
    we_mat = We.T.astype(jnp.bfloat16)                                  # (C, T)

    g_out, attn_out = pl.pallas_call(
        _attention_kernel,
        out_shape=(
            jax.ShapeDtypeStruct((B, T, C), jnp.float32),
            jax.ShapeDtypeStruct((B, T, N), jnp.float32),
        ),
        grid=(B // bb,),
        in_specs=[
            pl.BlockSpec((bb, N, C), lambda b: (b, 0, 0)),  # enc (bf16)
            pl.BlockSpec((N, C), lambda b: (0, 0)),         # tbase (constant block)
            pl.BlockSpec((C, C), lambda b: (0, 0)),         # WvT   (constant block)
            pl.BlockSpec((C, T), lambda b: (0, 0)),         # WeT   (constant block)
        ],
        out_specs=(
            pl.BlockSpec((bb, T, C), lambda b: (b, 0, 0)),
            pl.BlockSpec((bb, T, N), lambda b: (b, 0, 0)),
        ),
        compiler_params=pltpu.CompilerParams(
            dimension_semantics=("parallel",),         # shards batch over v7x's 2 TCs
            vmem_limit_bytes=32 * 1024 * 1024),        # headroom above v5e's 16 MiB default
    )(enc_bf, tbase, wv_mat, we_mat)

    # attn.view(B, T, 8, 32)
    attn4d = attn_out.reshape(B, T, 8, 32)
    return g_out, attn4d


def attention_reference(enc_output_nchw, params):
    """Pure-JAX reference mirroring the PyTorch forward, for validation."""
    B, C, H, W = enc_output_nchw.shape
    N = H * W
    T = params["emb"].shape[0]
    enc = jnp.transpose(enc_output_nchw, (0, 2, 3, 1)).reshape(B, N, C)
    E = params["emb"]
    ro_embed = jnp.broadcast_to(E[None], (B, T, C))                       # (B, T, C)
    t = jnp.einsum("bct,nt->bcn", jnp.transpose(ro_embed, (0, 2, 1)),
                   params["w0_w"]) + params["w0_b"]                       # (B, C, N)
    t = jnp.tanh(jnp.transpose(t, (0, 2, 1)) +
                 jnp.einsum("bnc,dc->bnd", enc, params["wv_w"]) + params["wv_b"])
    attn = jnp.einsum("bnc,tc->bnt", t, params["we_w"]) + params["we_b"]  # (B, N, T)
    attn = jax.nn.softmax(jnp.transpose(attn, (0, 2, 1)), axis=2)         # (B, T, N)
    g = jnp.einsum("btn,bnc->btc", attn, enc)
    return g, attn.reshape(B, T, 8, 32)


def make_params(key, in_channels, max_length, n_feature):
    ks = jax.random.split(key, 7)
    return {
        "emb": jax.random.normal(ks[0], (max_length, in_channels), jnp.float32),
        "w0_w": jax.random.normal(ks[1], (n_feature, max_length), jnp.float32) * 0.05,
        "w0_b": jax.random.normal(ks[2], (n_feature,), jnp.float32) * 0.05,
        "wv_w": jax.random.normal(ks[3], (in_channels, in_channels), jnp.float32) * 0.05,
        "wv_b": jax.random.normal(ks[4], (in_channels,), jnp.float32) * 0.05,
        "we_w": jax.random.normal(ks[5], (max_length, in_channels), jnp.float32) * 0.05,
        "we_b": jax.random.normal(ks[6], (max_length,), jnp.float32) * 0.05,
    }


if __name__ == "__main__":
    # The attn reshape (…, 8, 32) forces H*W == 256, so H=W=16.  C=128 keeps
    # the test small while keeping the g output lane-dense (C multiple of 128).
    B, C, H, W = 2, 128, 16, 16          # in_channels = 128
    T = 25                               # max_length
    NF = H * W                           # n_feature = 256

    key = jax.random.PRNGKey(0)
    k_x, k_p = jax.random.split(key)
    x = jax.random.normal(k_x, (B, C, H, W), jnp.float32)
    params = make_params(k_p, C, T, NF)

    fwd = jax.jit(functools.partial(attention_forward, params=params))
    g_out, attn4d = fwd(x)
    jax.block_until_ready((g_out, attn4d))

    g_ref, attn_ref = attention_reference(x, params)
    assert g_out.shape == (B, T, C) and attn4d.shape == (B, T, 8, 32)
    # bf16 matmul / tanh tolerances (kernel accumulates in f32).
    assert jnp.allclose(g_out, g_ref, atol=1e-2, rtol=1e-2)
    assert jnp.allclose(attn4d, attn_ref, atol=1e-3)
    # softmax rows must still sum to exactly ~1 (exact reciprocal used).
    assert jnp.allclose(attn4d.reshape(B, T, -1).sum(-1), 1.0, atol=1e-5)

    print("KERNEL_OK")
</pallas_src>

<mosaic_0001>
module attributes {stable_mosaic.version = 11 : i64} {
  func.func @_attention_kernel(%arg0: i32, %arg1: memref<1x256x128xbf16, #tpu.memory_space<vmem>>, %arg2: memref<256x128xbf16, #tpu.memory_space<vmem>>, %arg3: memref<128x128xbf16, #tpu.memory_space<vmem>>, %arg4: memref<128x25xbf16, #tpu.memory_space<vmem>>, %arg5: memref<1x25x128xf32, #tpu.memory_space<vmem>>, %arg6: memref<1x25x256xf32, #tpu.memory_space<vmem>>) attributes {dimension_semantics = [#tpu.dimension_semantics<parallel>], iteration_bounds = array<i64: 2>, scalar_prefetch = 0 : i64, scratch_operands = 0 : i64, tpu.core_type = #tpu.core_type<tc>, window_params = [{transform_indices = @transform_0, window_bounds = array<i64: 1, 256, 128>}, {pipeline_mode = #tpu.pipeline_mode<synchronous>, transform_indices = @transform_1, window_bounds = array<i64: 256, 128>}, {pipeline_mode = #tpu.pipeline_mode<synchronous>, transform_indices = @transform_2, window_bounds = array<i64: 128, 128>}, {pipeline_mode = #tpu.pipeline_mode<synchronous>, transform_indices = @transform_3, window_bounds = array<i64: 128, 25>}, {transform_indices = @transform_4, window_bounds = array<i64: 1, 25, 128>}, {transform_indices = @transform_5, window_bounds = array<i64: 1, 25, 256>}]} {
    %c0 = arith.constant 0 : index
    %c0_0 = arith.constant 0 : index
    %c0_1 = arith.constant 0 : index
    %0 = vector.load %arg1[%c0, %c0_0, %c0_1] : memref<1x256x128xbf16, #tpu.memory_space<vmem>>, vector<1x256x128xbf16>
    %1 = vector.shape_cast %0 : vector<1x256x128xbf16> to vector<256x128xbf16>
    %c0_2 = arith.constant 0 : index
    %c0_3 = arith.constant 0 : index
    %2 = vector.load %arg3[%c0_2, %c0_3] : memref<128x128xbf16, #tpu.memory_space<vmem>>, vector<128x128xbf16>
    %cst = arith.constant dense<0.000000e+00> : vector<256x128xf32>
    %3 = tpu.matmul %1, %2, %cst {dimension_numbers = #tpu.dot_dimension_numbers<[1], [0], [0], [1], [0, 0, 1, 1], [], []>} : vector<256x128xbf16>, vector<128x128xbf16>, vector<256x128xf32> -> vector<256x128xf32>
    %4 = vector.shape_cast %3 : vector<256x128xf32> to vector<1x256x128xf32>
    %5 = arith.truncf %4 : vector<1x256x128xf32> to vector<1x256x128xbf16>
    %c0_4 = arith.constant 0 : index
    %c0_5 = arith.constant 0 : index
    %6 = vector.load %arg2[%c0_4, %c0_5] : memref<256x128xbf16, #tpu.memory_space<vmem>>, vector<256x128xbf16>
    %7 = vector.shape_cast %6 : vector<256x128xbf16> to vector<1x256x128xbf16>
    %8 = arith.addf %5, %7 : vector<1x256x128xbf16>
    %9 = math.tanh %8 : vector<1x256x128xbf16>
    %10 = vector.shape_cast %9 : vector<1x256x128xbf16> to vector<256x128xbf16>
    %c0_6 = arith.constant 0 : index
    %c0_7 = arith.constant 0 : index
    %11 = vector.load %arg4[%c0_6, %c0_7] : memref<128x25xbf16, #tpu.memory_space<vmem>>, vector<128x25xbf16>
    %cst_8 = arith.constant dense<0.000000e+00> : vector<256x25xf32>
    %12 = tpu.matmul %10, %11, %cst_8 {dimension_numbers = #tpu.dot_dimension_numbers<[1], [0], [0], [1], [0, 0, 1, 1], [], []>} : vector<256x128xbf16>, vector<128x25xbf16>, vector<256x25xf32> -> vector<256x25xf32>
    %13 = vector.shape_cast %12 : vector<256x25xf32> to vector<1x256x25xf32>
    %14 = tpu.transpose %13, [0, 2, 1] : vector<1x256x25xf32> -> vector<1x25x256xf32>
    %cst_9 = arith.constant dense<0xFF800000> : vector<1x25xf32>
    %15 = vector.multi_reduction <maximumf>, %14, %cst_9 [2] : vector<1x25x256xf32> to vector<1x25xf32>
    %16 = vector.shape_cast %15 : vector<1x25xf32> to vector<1x25x1xf32>
    %17 = vector.broadcast %16 : vector<1x25x1xf32> to vector<1x25x256xf32>
    %18 = arith.subf %14, %17 : vector<1x25x256xf32>
    %19 = math.exp %18 : vector<1x25x256xf32>
    %cst_10 = arith.constant dense<0.000000e+00> : vector<1x25xf32>
    %20 = vector.multi_reduction <add>, %19, %cst_10 [2] : vector<1x25x256xf32> to vector<1x25xf32>
    %21 = vector.shape_cast %20 : vector<1x25xf32> to vector<1x25x1xf32>
    %22 = tpu.reciprocal %21 : vector<1x25x1xf32> -> vector<1x25x1xf32>
    %23 = vector.broadcast %22 : vector<1x25x1xf32> to vector<1x25x256xf32>
    %24 = arith.mulf %19, %23 : vector<1x25x256xf32>
    %25 = arith.truncf %24 : vector<1x25x256xf32> to vector<1x25x256xbf16>
    "tpu.trace_start"() <{level = 10 : i32, message = "btn,bnc->btc"}> : () -> ()
    %cst_11 = arith.constant dense<0.000000e+00> : vector<1x25x128xf32>
    %26 = tpu.matmul %25, %0, %cst_11 {dimension_numbers = #tpu.dot_dimension_numbers<[2], [1], [1], [2], [0, 0, 0, 1, 1, 2], [0], [0]>} : vector<1x25x256xbf16>, vector<1x256x128xbf16>, vector<1x25x128xf32> -> vector<1x25x128xf32>
    "tpu.trace_stop"() : () -> ()
    %c0_12 = arith.constant 0 : index
    %c0_13 = arith.constant 0 : index
    %c0_14 = arith.constant 0 : index
    %27 = vector.load %arg5[%c0_12, %c0_13, %c0_14] : memref<1x25x128xf32, #tpu.memory_space<vmem>>, vector<1x25x128xf32>
    tpu.vector_store %arg5[%c0_12, %c0_13, %c0_14], %26 {strides = array<i32>} : memref<1x25x128xf32, #tpu.memory_space<vmem>>, vector<1x25x128xf32>,
    %c0_15 = arith.constant 0 : index
    %c0_16 = arith.constant 0 : index
    %c0_17 = arith.constant 0 : index
    %28 = vector.load %arg6[%c0_15, %c0_16, %c0_17] : memref<1x25x256xf32, #tpu.memory_space<vmem>>, vector<1x25x256xf32>
    tpu.vector_store %arg6[%c0_15, %c0_16, %c0_17], %24 {strides = array<i32>} : memref<1x25x256xf32, #tpu.memory_space<vmem>>, vector<1x25x256xf32>,
    return
  }
  func.func @transform_0(%arg0: i32) -> (i32, i32, i32) {
    %c0_i32 = arith.constant 0 : i32
    %c0_i32_0 = arith.constant 0 : i32
    %c0_i32_1 = arith.constant 0 : i32
    return %arg0, %c0_i32, %c0_i32_0 : i32, i32, i32
  }
  func.func @transform_1(%arg0: i32) -> (i32, i32) {
    %c0_i32 = arith.constant 0 : i32
    %c0_i32_0 = arith.constant 0 : i32
    %c0_i32_1 = arith.constant 0 : i32
    return %c0_i32, %c0_i32_0 : i32, i32
  }
  func.func @transform_2(%arg0: i32) -> (i32, i32) {
    %c0_i32 = arith.constant 0 : i32
    %c0_i32_0 = arith.constant 0 : i32
    %c0_i32_1 = arith.constant 0 : i32
    return %c0_i32, %c0_i32_0 : i32, i32
  }
  func.func @transform_3(%arg0: i32) -> (i32, i32) {
    %c0_i32 = arith.constant 0 : i32
    %c0_i32_0 = arith.constant 0 : i32
    %c0_i32_1 = arith.constant 0 : i32
    return %c0_i32, %c0_i32_0 : i32, i32
  }
  func.func @transform_4(%arg0: i32) -> (i32, i32, i32) {
    %c0_i32 = arith.constant 0 : i32
    %c0_i32_0 = arith.constant 0 : i32
    %c0_i32_1 = arith.constant 0 : i32
    return %arg0, %c0_i32, %c0_i32_0 : i32, i32, i32
  }
  func.func @transform_5(%arg0: i32) -> (i32, i32, i32) {
    %c0_i32 = arith.constant 0 : i32
    %c0_i32_0 = arith.constant 0 : i32
    %c0_i32_1 = arith.constant 0 : i32
    return %arg0, %c0_i32, %c0_i32_0 : i32, i32, i32
  }
}

</mosaic_0001>

<bundles_post_ra>
// kernel: attention_forward.1
= control target key start
LH: loop header
LB: loop body
LE: loop exit
PB: predicated region body
PF: predicated region fallthrough
CT: control target
= control target key end

     0   :  { %s1677_s18 = smov 0   ;;  %s1900_s0 = inlined_call_operand.vmem [shape: bf16[2,256,128], index: 0, kind: input, shape index: {}]   ;;  %s1901_s1 = inlined_call_operand.vmem [shape: bf16[256,128], index: 1, kind: input, shape index: {}]   ;;  %s1902_s2 = inlined_call_operand.vmem [shape: bf16[128,128], index: 2, kind: input, shape index: {}]   ;;  %s1903_s3 = inlined_call_operand.vmem [shape: bf16[128,25], index: 3, kind: input, shape index: {}]   ;;  %s1904_s4 = inlined_call_operand.vmem [shape: f32[2,25,128], index: 4, kind: output, shape index: {0}]   ;;  %s1905_s5 = inlined_call_operand.vmem [shape: f32[2,25,256], index: 5, kind: output, shape index: {1}]  }
   0x1 LB: > { %s1275_s19 = sadd.s32 4294967295, %s1645_s18   ;;  %p1279_p0 = scmp.ge.s32.totalorder %s1645_s18, 1  ;;  %s1645_s18 = sphi %s1677_s18, %s16_s18  }
   0x2   : > { %p190_p1 = scmp.lt.s32.totalorder %s1645_s18, 3 }
   0x4   : > { %p191_p2 = pnand %p1279_p0, %p190_p1 }
   0x5   : > { %v1535_v0 = vld [vmem:[%s1902_s2] sm:$0xff] (!%p191_p2)   ;;  %p223_p3 = scmp.lt.s32.totalorder (!%p191_p2), %s1275_s19, 1  ;;  %v1536_v1 = vld [vmem:[%s1902_s2 + $0x8] sm:$0xff] (!%p191_p2)   ;;  %v1537_v2 = vld [vmem:[%s1902_s2 + $0x10] sm:$0xff] (!%p191_p2)   ;;  %vm1066_vm0 = vcmask (!%p191_p2), 1040384  }
   0x6   : > { %194 = sbr.rel (%p191_p2) target bundleno = 1196 (0x4ac), region = 36  ;;  %1415 = vmatprep.subr.bf16.mxu0 (!%p191_p2), %v1535_v0  ;;  %v1538_v3 = vld [vmem:[%s1902_s2 + $0x18] sm:$0xff] (!%p191_p2)   ;;  %v1539_v5 = vld [vmem:[%s1902_s2 + $0x20] sm:$0xff] (!%p191_p2)   ;;  %v1540_v6 = vld [vmem:[%s1902_s2 + $0x28] sm:$0xff] (!%p191_p2)  }
   0x7   : > { %1416 = vmatpush3.bf16.msra.mxu0 (!%p191_p2), %v1535_v0  ;;  %v1541_v7 = vld [vmem:[%s1902_s2 + $0x30] sm:$0xff] (!%p191_p2)   ;;  %v1542_v8 = vld [vmem:[%s1902_s2 + $0x38] sm:$0xff] (!%p191_p2)   ;;  %v1559_v9 = vld [vmem:[%s1903_s3] sm:$0xff] (!%p191_p2)  }
   0x8   : > { %1417 = vmatprep.subr.bf16.mxu0 (!%p191_p2), %v1536_v1  ;;  %v1560_v10 = vld [vmem:[%s1903_s3 + $0x8] sm:$0xff] (!%p191_p2)   ;;  %1463 = vmatprep.subr.bf16.mxu1 (!%p191_p2), %v1559_v9  ;;  %v1561_v11 = vld [vmem:[%s1903_s3 + $0x10] sm:$0xff] (!%p191_p2)   ;;  %v1562_v27 = vld [vmem:[%s1903_s3 + $0x18] sm:$0xff] (!%p191_p2)  }
   0x9   : > { %1464 = vmatpush3.bf16.msra.mxu1 (!%p191_p2), %v1559_v9  ;;  %v1565_v28 = vld [vmem:[%s1903_s3 + $0x20] sm:$0xff] (!%p191_p2)   ;;  %v1566_v29 = vld [vmem:[%s1903_s3 + $0x28] sm:$0xff] (!%p191_p2)   ;;  %v1569_v30 = vld [vmem:[%s1903_s3 + $0x30] sm:$0xff] (!%p191_p2)  }
   0xa   : > { %1465 = vmatprep.subr.bf16.mxu1 (!%p191_p2), %v1560_v10  ;;  %v1570_v31 = vld [vmem:[%s1903_s3 + $0x38] sm:$0xff] (!%p191_p2)   ;;  %v1563_v34 = vld [vmem:[%s1901_s1 + $0x8] sm:$0xff] (!%p191_p2)   ;;  %v1564_v36 = vld [vmem:[%s1901_s1] sm:$0xff] (!%p191_p2)  }
   0xb   : > { %1418 = vmatpush3.bf16.msra.mxu0 (!%p191_p2), %v1536_v1  ;;  %v1567_v44 = vld [vmem:[%s1901_s1 + $0x18] sm:$0xff] (!%p191_p2)   ;;  %v1568_v46 = vld [vmem:[%s1901_s1 + $0x10] sm:$0xff] (!%p191_p2)   ;;  %v1571_v54 = vld [vmem:[%s1901_s1 + $0x28] sm:$0xff] (!%p191_p2)  }
   0xc   : > { %1419 = vmatprep.subr.bf16.mxu0 (!%p191_p2), %v1537_v2  ;;  %v1572_v56 = vld [vmem:[%s1901_s1 + $0x20] sm:$0xff] (!%p191_p2)  }
   0xd   : > { %s1907_s19 = smov (!%p223_p3, %s1275_s19), 1  ;;  %1466 = vmatpush3.bf16.msra.mxu1 %v1560_v10 }
   0xe   : > { %s1336_s26 = sshll.u32 %s1907_s19, 7  ;;  %1467 = vmatprep.subr.bf16.mxu1 %v1561_v11  ;;  %s1338_s17 = sshll.u32 %s1907_s19, 6 }
   0xf   : > { %s1700_s29 = scalar_lea.vmem %s1900_s0, %s1336_s26  ;;  %1420 = vmatpush3.bf16.msra.mxu0 %v1537_v2  ;;  %v1573_v2 = vld [vmem:[%s1901_s1 + $0x38] sm:$0xff]   ;;  %s237_s22 = scalar_lea.vmem %s1905_s5, %s1338_s17 }
  0x10   : > { %v1706_v4 = vld [vmem:[%s1700_s29] sm:$0xff]   ;;  %1421 = vmatprep.subr.bf16.mxu0 %v1538_v3  ;;  %v1731_v12 = vld [vmem:[%s1700_s29 + $0x8] sm:$0xff]   ;;  %v1737_v14 = vld [vmem:[%s1700_s29 + $0x10] sm:$0xff]   ;;  %s1337_s23 = sshll.u32 %s1907_s19, 5 }
  0x11   : > { %1431 = vmatprep.mubr.bf16.mxu0 %v1706_v4  ;;  %v1734_v13 = vld [vmem:[%s1700_s29 + $0x40] sm:$0xff]   ;;  %v1741_v15 = vld [vmem:[%s1700_s29 + $0x48] sm:$0xff]   ;;  %1468 = vmatpush3.bf16.msra.mxu1 %v1561_v11  ;;  %v1746_v16 = vld [vmem:[%s1700_s29 + $0x18] sm:$0xff]   ;;  %s232_s26 = scalar_lea.vmem %s1904_s4, %s1337_s23 }
  0x12   : > { %v1750_v17 = vld [vmem:[%s1700_s29 + $0x20] sm:$0xff]   ;;  %v1753_v18 = vld [vmem:[%s1700_s29 + $0x50] sm:$0xff]   ;;  %v1761_v19 = vld [vmem:[%s1700_s29 + $0x58] sm:$0xff]   ;;  %1469 = vmatprep.subr.bf16.mxu1 %v1562_v27 }
  0x13   : > { %1422 = vmatpush3.bf16.msra.mxu0 %v1538_v3  ;;  %v1766_v20 = vld [vmem:[%s1700_s29 + $0x28] sm:$0xff]   ;;  %v1769_v21 = vld [vmem:[%s1700_s29 + $0x30] sm:$0xff]   ;;  %v1772_v22 = vld [vmem:[%s1700_s29 + $0x60] sm:$0xff]  }
  0x14   : > { %1423 = vmatprep.subr.bf16.mxu0 %v1539_v5  ;;  %v1779_v23 = vld [vmem:[%s1700_s29 + $0x68] sm:$0xff]   ;;  %v1784_v24 = vld [vmem:[%s1700_s29 + $0x38] sm:$0xff]   ;;  %v1787_v25 = vld [vmem:[%s1700_s29 + $0x70] sm:$0xff]  }
  0x15   : > { %v1794_v26 = vld [vmem:[%s1700_s29 + $0x78] sm:$0xff]   ;;  %1470 = vmatpush3.bf16.msra.mxu1 %v1562_v27 }
  0x16   : > { %1471 = vmatprep.subr.bf16.mxu1 %v1565_v28 }
  0x17   : > { %1424 = vmatpush3.bf16.msra.mxu0 %v1539_v5  ;;  %v1574_v5 = vld [vmem:[%s1901_s1 + $0x30] sm:$0xff]  }
  0x18   : > { %1425 = vmatprep.subr.bf16.mxu0 %v1540_v6 }
  0x19   : > { %1472 = vmatpush3.bf16.msra.mxu1 %v1565_v28 }
  0x1a   : > { %1473 = vmatprep.subr.bf16.mxu1 %v1566_v29 }
  0x1b   : > { %1426 = vmatpush3.bf16.msra.mxu0 %v1540_v6 }
  0x1c   : > { %1427 = vmatprep.subr.bf16.mxu0 %v1541_v7 }
  0x1d   : > { %1474 = vmatpush3.bf16.msra.mxu1 %v1566_v29 }
  0x1e   : > { %1475 = vmatprep.subr.bf16.mxu1 %v1569_v30 }
  0x1f   : > { %1428 = vmatpush3.bf16.msra.mxu0 %v1541_v7 }
  0x20   : > { %1429 = vmatprep.subr.bf16.mxu0 %v1542_v8 }
  0x21   : > { %1476 = vmatpush3.bf16.msra.mxu1 %v1569_v30 }
  0x22   : > { %1477 = vmatprep.subr.bf16.mxu1 %v1570_v31 }
  0x23   : > { %1430 = vmatpush3.bf16.msra.mxu0 %v1542_v8 }
  0x24   : > { %1387 = vmatprep.subr.bf16.mxu0 %v1734_v13 }
  0x25   : > { %1478 = vmatpush3.bf16.msra.mxu1 %v1570_v31 }
  0x26   : > { %1432 = vmatmul.mubr.bf16.vlgmr.msra.gmra.mrb[0].mxu0 %v1731_v12  ;;  %1511 = vmatprep.subr.bf16.mxu1 %v1734_v13 }
  0x27   : > { %1435 = vmatprep.mubr.bf16.mxu0 %v1737_v14  ;;  %1388 = vmatpush3.bf16.msra.mxu0 %v1706_v4 }
  0x28   : > { %1389 = vmatprep.subr.bf16.mxu0 %v1741_v15 }
  0x2b   : > { %1390 = vmatpush3.bf16.msra.mxu0 %v1731_v12 }
  0x2c   : > { %1391 = vmatprep.subr.bf16.mxu0 %v1753_v18 }
  0x2e   : > { %1436 = vmatmul.mubr.bf16.gmra.mrb[4].mxu0 %v1746_v16 }
  0x2f   : > { %1439 = vmatprep.mubr.bf16.mxu0 %v1750_v17  ;;  %1392 = vmatpush3.bf16.msra.mxu0 %v1737_v14 }
  0x30   : > { %1393 = vmatprep.subr.bf16.mxu0 %v1761_v19 }
  0x33   : > { %1394 = vmatpush3.bf16.msra.mxu0 %v1746_v16 }
  0x34   : > { %1395 = vmatprep.subr.bf16.mxu0 %v1772_v22 }
  0x36   : > { %1440 = vmatmul.mubr.bf16.gmra.mrb[8].mxu0 %v1766_v20 }
  0x37   : > { %1443 = vmatprep.mubr.bf16.mxu0 %v1769_v21  ;;  %1396 = vmatpush3.bf16.msra.mxu0 %v1750_v17 }
  0x38   : > { %1397 = vmatprep.subr.bf16.mxu0 %v1779_v23 }
  0x3b   : > { %1398 = vmatpush3.bf16.msra.mxu0 %v1766_v20 }
  0x3c   : > { %1399 = vmatprep.subr.bf16.mxu0 %v1787_v25 }
  0x3e   : > { %1444 = vmatmul.mubr.bf16.gmra.mrb[12].mxu0 %v1784_v24 }
  0x3f   : > { %1447 = vmatprep.mubr.bf16.mxu0 %v1734_v13  ;;  %1400 = vmatpush3.bf16.msra.mxu0 %v1769_v21 }
  0x40   : > { %1401 = vmatprep.subr.bf16.mxu0 %v1794_v26 }
  0x43   : > { %1402 = vmatpush3.bf16.msra.mxu0 %v1784_v24 }
  0x46   : > { %1448 = vmatmul.mubr.bf16.gmra.mrb[16].mxu0 %v1741_v15 }
  0x47   : > { %1451 = vmatprep.mubr.bf16.mxu0 %v1753_v18 }
  0x4e   : > { %1452 = vmatmul.mubr.bf16.gmra.mrb[20].mxu0 %v1761_v19 }
  0x4f   : > { %1455 = vmatprep.mubr.bf16.mxu0 %v1772_v22 }
  0x56   : > { %1456 = vmatmul.mubr.bf16.gmra.mrb[24].mxu0 %v1779_v23 }
  0x57   : > { %1459 = vmatprep.mubr.bf16.mxu0 %v1787_v25 }
  0x5e   : > { %1460 = vmatmul.mubr.bf16.gmra.mrb[28].mxu0 %v1794_v26 }
  0xf9   : > { %v1433_v32 = vpop.f32.mrb[0].mxu0 }
  0xfa   : > { %v465_v33 = vpop.f32.mrb[1].mxu0 }
  0xfb   : > { %v1434_v35 = vpop.f32.mrb[2].mxu0 }
  0xfc   : > { %v593_v37 = vpack.c.bf16 %v1434_v35, %v1433_v32  ;;  %v468_v38 = vpop.f32.mrb[3].mxu0 }
  0xfd   : > { %v592_v39 = vpack.c.bf16 %v468_v38, %v465_v33 }
  0xfe   : > { %v737_v40 = vadd.bf16 %v1563_v34, %v593_v37 }
  0xff   : > { %v736_v41 = vadd.bf16 %v1564_v36, %v592_v39 }
 0x101   : > { %v1437_v42 = vpop.f32.mrb[4].mxu0  ;;  %1583 = vtanh.bf16 %v736_v41 }
 0x102   : > { %1585 = vtanh.bf16 %v737_v40  ;;  %v481_v43 = vpop.f32.mrb[5].mxu0 }
 0x103   : > { %v1438_v45 = vpop.f32.mrb[6].mxu0 }
 0x104   : > { %v595_v47 = vpack.c.bf16 %v1438_v45, %v1437_v42  ;;  %v484_v48 = vpop.f32.mrb[7].mxu0 }
 0x105   : > { %v594_v49 = vpack.c.bf16 %v484_v48, %v481_v43 }
 0x106   : > { %v739_v50 = vadd.bf16 %v1567_v44, %v595_v47 }
 0x107   : > { %v738_v51 = vadd.bf16 %v1568_v46, %v594_v49 }
 0x109   : > { %1587 = vtanh.bf16 %v738_v51  ;;  %v1441_v52 = vpop.f32.mrb[8].mxu0  ;;  %v1581_v51 = vld [vmem:[%s1901_s1 + $0x78] sm:$0xff]  }
 0x10a   : > { %1589 = vtanh.bf16 %v739_v50  ;;  %v497_v53 = vpop.f32.mrb[9].mxu0 }
 0x10b   : > { %v1442_v55 = vpop.f32.mrb[10].mxu0 }
 0x10c   : > { %v1584_v57 = vpop.eup %1583  ;;  %v597_v58 = vpack.c.bf16 %v1442_v55, %v1441_v52  ;;  %v500_v59 = vpop.f32.mrb[11].mxu0 }
 0x10d   : > { %v1586_v60 = vpop.eup %1585  ;;  %v596_v61 = vpack.c.bf16 %v500_v59, %v497_v53  ;;  %1479 = vmatprep.mubr.bf16.mxu1 %v1584_v57 }
 0x10e   : > { %v741_v62 = vadd.bf16 %v1571_v54, %v597_v58  ;;  %1480 = vmatmul.mubr.bf16.vlgmr.msra.gmra.mrb[0].mxu1 %v1586_v60 }
 0x10f   : > { %v740_v63 = vadd.bf16 %v1572_v56, %v596_v61  ;;  %1519 = vmatpush3.bf16.msra.mxu1 %v1706_v4 }
 0x110   : > { %1512 = vmatprep.subr.bf16.mxu1 %v1741_v15 }
 0x111   : > { %1591 = vtanh.bf16 %v740_v63  ;;  %v1445_v0 = vpop.f32.mrb[12].mxu0 }
 0x112   : > { %1593 = vtanh.bf16 %v741_v62  ;;  %v513_v1 = vpop.f32.mrb[13].mxu0 }
 0x113   : > { %v1446_v3 = vpop.f32.mrb[14].mxu0  ;;  %1520 = vmatpush3.bf16.msra.mxu1 %v1731_v12  ;;  %v1575_v12 = vld [vmem:[%s1901_s1 + $0x48] sm:$0xff]  }
 0x114   : > { %v1588_v6 = vpop.eup %1587  ;;  %v599_v7 = vpack.c.bf16 %v1446_v3, %v1445_v0  ;;  %v516_v4 = vpop.f32.mrb[15].mxu0  ;;  %1513 = vmatprep.subr.bf16.mxu1 %v1753_v18  ;;  %v1576_v18 = vld [vmem:[%s1901_s1 + $0x40] sm:$0xff]  }
 0x115   : > { %v1590_v8 = vpop.eup %1589  ;;  %v598_v9 = vpack.c.bf16 %v516_v4, %v513_v1  ;;  %1483 = vmatprep.mubr.bf16.mxu1 %v1588_v6 }
 0x116   : > { %v743_v10 = vadd.bf16 %v1573_v2, %v599_v7  ;;  %1484 = vmatmul.mubr.bf16.gmra.mrb[4].mxu1 %v1590_v8 }
 0x117   : > { %v742_v11 = vadd.bf16 %v1574_v5, %v598_v9  ;;  %1521 = vmatpush3.bf16.msra.mxu1 %v1737_v14 }
 0x118   : > { %1514 = vmatprep.subr.bf16.mxu1 %v1761_v19 }
 0x119   : > { %1595 = vtanh.bf16 %v742_v11  ;;  %v1449_v13 = vpop.f32.mrb[16].mxu0 }
 0x11a   : > { %1597 = vtanh.bf16 %v743_v10  ;;  %v529_v15 = vpop.f32.mrb[17].mxu0 }
 0x11b   : > { %v1450_v27 = vpop.f32.mrb[18].mxu0  ;;  %1522 = vmatpush3.bf16.msra.mxu1 %v1746_v16  ;;  %v1577_v16 = vld [vmem:[%s1901_s1 + $0x58] sm:$0xff]  }
 0x11c   : > { %v1592_v28 = vpop.eup %1591  ;;  %v601_v29 = vpack.c.bf16 %v1450_v27, %v1449_v13  ;;  %v532_v14 = vpop.f32.mrb[19].mxu0  ;;  %1515 = vmatprep.subr.bf16.mxu1 %v1772_v22  ;;  %v1578_v22 = vld [vmem:[%s1901_s1 + $0x50] sm:$0xff]  }
 0x11d   : > { %v1594_v19 = vpop.eup %1593  ;;  %v600_v30 = vpack.c.bf16 %v532_v14, %v529_v15  ;;  %1487 = vmatprep.mubr.bf16.mxu1 %v1592_v28 }
 0x11e   : > { %v745_v31 = vadd.bf16 %v1575_v12, %v601_v29  ;;  %1488 = vmatmul.mubr.bf16.gmra.mrb[8].mxu1 %v1594_v19 }
 0x11f   : > { %v744_v32 = vadd.bf16 %v1576_v18, %v600_v30  ;;  %1523 = vmatpush3.bf16.msra.mxu1 %v1750_v17 }
 0x120   : > { %1516 = vmatprep.subr.bf16.mxu1 %v1779_v23 }
 0x121   : > { %1599 = vtanh.bf16 %v744_v32  ;;  %v1453_v33 = vpop.f32.mrb[20].mxu0 }
 0x122   : > { %1601 = vtanh.bf16 %v745_v31  ;;  %v545_v34 = vpop.f32.mrb[21].mxu0 }
 0x123   : > { %v1454_v35 = vpop.f32.mrb[22].mxu0  ;;  %1524 = vmatpush3.bf16.msra.mxu1 %v1766_v20  ;;  %v1579_v20 = vld [vmem:[%s1901_s1 + $0x68] sm:$0xff]  }
 0x124   : > { %v1596_v36 = vpop.eup %1595  ;;  %v603_v37 = vpack.c.bf16 %v1454_v35, %v1453_v33  ;;  %v548_v17 = vpop.f32.mrb[23].mxu0  ;;  %1517 = vmatprep.subr.bf16.mxu1 %v1787_v25  ;;  %v1580_v25 = vld [vmem:[%s1901_s1 + $0x60] sm:$0xff]  }
 0x125   : > { %v1598_v23 = vpop.eup %1597  ;;  %v602_v38 = vpack.c.bf16 %v548_v17, %v545_v34  ;;  %1491 = vmatprep.mubr.bf16.mxu1 %v1596_v36 }
 0x126   : > { %v747_v39 = vadd.bf16 %v1577_v16, %v603_v37  ;;  %1492 = vmatmul.mubr.bf16.gmra.mrb[12].mxu1 %v1598_v23 }
 0x127   : > { %v746_v40 = vadd.bf16 %v1578_v22, %v602_v38  ;;  %1525 = vmatpush3.bf16.msra.mxu1 %v1769_v21 }
 0x128   : > { %1603 = vtanh.bf16 %v747_v39  ;;  %1518 = vmatprep.subr.bf16.mxu1 %v1794_v26 }
 0x129   : > { %1605 = vtanh.bf16 %v746_v40  ;;  %v1457_v41 = vpop.f32.mrb[24].mxu0 }
 0x12a   : > { %v561_v42 = vpop.f32.mrb[25].mxu0 }
 0x12b   : > { %v1458_v43 = vpop.f32.mrb[26].mxu0  ;;  %1526 = vmatpush3.bf16.msra.mxu1 %v1784_v24  ;;  %v1582_v24 = vld [vmem:[%s1901_s1 + $0x70] sm:$0xff]  }
 0x12c   : > { %v1600_v44 = vpop.eup %1599  ;;  %v605_v45 = vpack.c.bf16 %v1458_v43, %v1457_v41  ;;  %v564_v21 = vpop.f32.mrb[27].mxu0 }
 0x12d   : > { %v1602_v46 = vpop.eup %1601  ;;  %1495 = vmatprep.mubr.bf16.mxu1 %v1600_v44  ;;  %v604_v26 = vpack.c.bf16 %v564_v21, %v561_v42 }
 0x12e   : > { %1496 = vmatmul.mubr.bf16.gmra.mrb[16].mxu1 %v1602_v46  ;;  %v749_v47 = vadd.bf16 %v1579_v20, %v605_v45 }
 0x12f   : > { %v748_v48 = vadd.bf16 %v1580_v25, %v604_v26 }
 0x130   : > { %1607 = vtanh.bf16 %v749_v47 }
 0x131   : > { %1609 = vtanh.bf16 %v748_v48  ;;  %v1461_v49 = vpop.f32.mrb[28].mxu0 }
 0x132   : > { %v577_v50 = vpop.f32.mrb[29].mxu0 }
 0x133   : > { %v1604_v52 = vpop.eup %1603  ;;  %v1462_v53 = vpop.f32.mrb[30].mxu0 }
 0x134   : > { %v1606_v54 = vpop.eup %1605  ;;  %v607_v55 = vpack.c.bf16 %v1462_v53, %v1461_v49  ;;  %v580_v56 = vpop.f32.mrb[31].mxu0 }
 0x135   : > { %1499 = vmatprep.mubr.bf16.mxu1 %v1606_v54  ;;  %v606_v57 = vpack.c.bf16 %v580_v56, %v577_v50 }
 0x136   : > { %1500 = vmatmul.mubr.bf16.gmra.mrb[20].mxu1 %v1604_v52  ;;  %v751_v58 = vadd.bf16 %v1581_v51, %v607_v55 }
 0x137   : > { %v750_v59 = vadd.bf16 %v1582_v24, %v606_v57 }
 0x138   : > { %1611 = vtanh.bf16 %v751_v58 }
 0x139   : > { %1613 = vtanh.bf16 %v750_v59 }
 0x13b   : > { %v1608_v60 = vpop.eup %1607 }
 0x13c   : > { %v1610_v61 = vpop.eup %1609 }
 0x13d   : > { %1503 = vmatprep.mubr.bf16.mxu1 %v1610_v61 }
 0x13e   : > { %1504 = vmatmul.mubr.bf16.gmra.mrb[24].mxu1 %v1608_v60 }
 0x143   : > { %v1612_v62 = vpop.eup %1611 }
 0x144   : > { %v1614_v63 = vpop.eup %1613 }
 0x145   : > { %1507 = vmatprep.mubr.bf16.mxu1 %v1614_v63 }
 0x146   : > { %1508 = vmatmul.mubr.bf16.gmra.mrb[28].mxu1 %v1612_v62 }
 0x1e1   : > { %v1481_v0 = vpop.f32.mrb[0].mxu1 }
 0x1e2   : > { %v866_v1 = vpop.f32.mrb[1].mxu1 }
 0x1e3   : > { %993 = vxpose.xlu0.b32.start [1/16] (narrow) %v866_v1, 32  ;;  %v1482_v2 = vpop.f32.mrb[2].mxu1 }
 0x1e4   : > { %v869_v3 = vpop.f32.mrb[3].mxu1 }
 0x1e7   : > { %994 = vxpose.xlu0.b32.cont [2/16] (narrow) %v869_v3, 32 }
 0x1e9   : > { %v1485_v5 = vpop.f32.mrb[4].mxu1 }
 0x1ea   : > { %v882_v6 = vpop.f32.mrb[5].mxu1 }
 0x1eb   : > { %995 = vxpose.xlu0.b32.cont [3/16] (narrow) %v1481_v0, 32  ;;  %v1486_v7 = vpop.f32.mrb[6].mxu1 }
 0x1ec   : > { %v885_v4 = vpop.f32.mrb[7].mxu1 }
 0x1ef   : > { %996 = vxpose.xlu0.b32.cont [4/16] (narrow) %v1482_v2, 32 }
 0x1f1   : > { %v1489_v8 = vpop.f32.mrb[8].mxu1 }
 0x1f2   : > { %v898_v9 = vpop.f32.mrb[9].mxu1 }
 0x1f3   : > { %997 = vxpose.xlu0.b32.cont [5/16] (narrow) %v882_v6, 32  ;;  %v1490_v10 = vpop.f32.mrb[10].mxu1 }
 0x1f4   : > { %v901_v11 = vpop.f32.mrb[11].mxu1 }
 0x1f7   : > { %998 = vxpose.xlu0.b32.cont [6/16] (narrow) %v885_v4, 32 }
 0x1f9   : > { %v1493_v13 = vpop.f32.mrb[12].mxu1 }
 0x1fa   : > { %v914_v15 = vpop.f32.mrb[13].mxu1 }
 0x1fb   : > { %999 = vxpose.xlu0.b32.cont [7/16] (narrow) %v1485_v5, 32  ;;  %v1494_v12 = vpop.f32.mrb[14].mxu1 }
 0x1fc   : > { %v917_v27 = vpop.f32.mrb[15].mxu1 }
 0x1ff   : > { %1000 = vxpose.xlu0.b32.cont [8/16] (narrow) %v1486_v7, 32 }
 0x201   : > { %v1497_v18 = vpop.f32.mrb[16].mxu1 }
 0x202   : > { %v930_v28 = vpop.f32.mrb[17].mxu1 }
 0x203   : > { %1001 = vxpose.xlu0.b32.cont [9/16] (narrow) %v898_v9, 32  ;;  %1025 = vxpose.xlu1.b32.start [1/16] (narrow) %v930_v28, 32  ;;  %v1498_v29 = vpop.f32.mrb[18].mxu1 }
 0x204   : > { %v933_v14 = vpop.f32.mrb[19].mxu1 }
 0x207   : > { %1002 = vxpose.xlu0.b32.cont [10/16] (narrow) %v901_v11, 32  ;;  %1026 = vxpose.xlu1.b32.cont [2/16] (narrow) %v933_v14, 32 }
 0x209   : > { %v1501_v19 = vpop.f32.mrb[20].mxu1 }
 0x20a   : > { %v946_v30 = vpop.f32.mrb[21].mxu1 }
 0x20b   : > { %1003 = vxpose.xlu0.b32.cont [11/16] (narrow) %v1489_v8, 32  ;;  %1027 = vxpose.xlu1.b32.cont [3/16] (narrow) %v1497_v18, 32  ;;  %v1502_v31 = vpop.f32.mrb[22].mxu1 }
 0x20c   : > { %v949_v32 = vpop.f32.mrb[23].mxu1 }
 0x20f   : > { %1004 = vxpose.xlu0.b32.cont [12/16] (narrow) %v1490_v10, 32  ;;  %1028 = vxpose.xlu1.b32.cont [4/16] (narrow) %v1498_v29, 32 }
 0x211   : > { %v1505_v33 = vpop.f32.mrb[24].mxu1 }
 0x212   : > { %v962_v34 = vpop.f32.mrb[25].mxu1 }
 0x213   : > { %1005 = vxpose.xlu0.b32.cont [13/16] (narrow) %v914_v15, 32  ;;  %1029 = vxpose.xlu1.b32.cont [5/16] (narrow) %v946_v30, 32  ;;  %v1506_v16 = vpop.f32.mrb[26].mxu1 }
 0x214   : > { %v965_v35 = vpop.f32.mrb[27].mxu1 }
 0x217   : > { %1006 = vxpose.xlu0.b32.cont [14/16] (narrow) %v917_v27, 32  ;;  %1030 = vxpose.xlu1.b32.cont [6/16] (narrow) %v949_v32, 32 }
 0x219   : > { %v1509_v22 = vpop.f32.mrb[28].mxu1 }
 0x21a   : > { %v978_v36 = vpop.f32.mrb[29].mxu1 }
 0x21b   : > { %1007 = vxpose.xlu0.b32.cont [15/16] (narrow) %v1493_v13, 32  ;;  %1031 = vxpose.xlu1.b32.cont [7/16] (narrow) %v1501_v19, 32  ;;  %v1510_v37 = vpop.f32.mrb[30].mxu1 }
 0x21c   : > { %v981_v17 = vpop.f32.mrb[31].mxu1 }
 0x21f   : > { %1008 = vxpose.xlu0.b32.end [16/16] (narrow) %v1494_v12, 32  ;;  %1032 = vxpose.xlu1.b32.cont [8/16] (narrow) %v1502_v31, 32 }
 0x223   : > { %1033 = vxpose.xlu1.b32.cont [9/16] (narrow) %v962_v34, 32 }
 0x227   : > { %1034 = vxpose.xlu1.b32.cont [10/16] (narrow) %v965_v35, 32 }
 0x22b   : > { %1035 = vxpose.xlu1.b32.cont [11/16] (narrow) %v1505_v33, 32 }
 0x22f   : > { %1036 = vxpose.xlu1.b32.cont [12/16] (narrow) %v1506_v16, 32 }
 0x233   : > { %1037 = vxpose.xlu1.b32.cont [13/16] (narrow) %v978_v36, 32 }
 0x237   : > { %1038 = vxpose.xlu1.b32.cont [14/16] (narrow) %v981_v17, 32 }
 0x23b   : > { %1039 = vxpose.xlu1.b32.cont [15/16] (narrow) %v1509_v22, 32 }
 0x23f   : > { %1040 = vxpose.xlu1.b32.end [16/16] (narrow) %v1510_v37, 32 }
 0x263   : > { %v1009_v23 = vpop.trf.xlu0 }
 0x267   : > { %v1010_v38 = vpop.trf.xlu0 }
 0x26b   : > { %v1011_v41 = vpop.trf.xlu0 }
 0x26f   : > { %v1012_v25 = vpop.trf.xlu0 }
 0x270   : > { %v1067_v45 = vsel %vm1066_vm0, %v1012_v25, -inf }
 0x283   : > { %v1041_v39 = vpop.trf.xlu1 }
 0x284   : > { %v1057_v40 = vmax.f32 %v1009_v23, %v1041_v39 }
 0x286   : > { %1058 = vmax.xlane.f32.xlu1 %v1057_v40 }
 0x287   : > { %v1042_v42 = vpop.trf.xlu1 }
 0x288   : > { %v1060_v20 = vmax.f32 %v1010_v38, %v1042_v42 }
 0x28a   : > { %1061 = vmax.xlane.f32.xlu1 %v1060_v20 }
 0x28b   : > { %v1043_v43 = vpop.trf.xlu1 }
 0x28c   : > { %v1063_v44 = vmax.f32 %v1011_v41, %v1043_v43 }
 0x28e   : > { %1064 = vmax.xlane.f32.xlu1 %v1063_v44 }
 0x28f   : > { %v1044_v21 = vpop.trf.xlu1 }
 0x290   : > { %v1068_v46 = vsel %vm1066_vm0, %v1044_v21, -inf }
 0x291   : > { %v1069_v26 = vmax.f32 %v1067_v45, %v1068_v46 }
 0x293   : > { %1070 = vmax.xlane.f32.xlu0 %v1069_v26 }
 0x313   : > { %v1059_v47 = vpop.xlane.xlu1 %1058 }
 0x314   : > { %v1072_v48 = vsub.f32 %v1009_v23, %v1059_v47  ;;  %v1073_v49 = vsub.f32 %v1041_v39, %v1059_v47 }
 0x316   : > { %v1080_v50 = vmul.f32 1.442695, %v1072_v48  ;;  %v1082_v51 = vmul.f32 1.442695, %v1073_v49 }
 0x317   : > { %v1062_v52 = vpop.xlane.xlu1 %1061 }
 0x318   : > { %1615 = vpow2.f32 %v1080_v50  ;;  %v1074_v53 = vsub.f32 %v1010_v38, %v1062_v52  ;;  %v1075_v24 = vsub.f32 %v1042_v42, %v1062_v52 }
 0x319   : > { %1617 = vpow2.f32 %v1082_v51 }
 0x31a   : > { %v1084_v54 = vmul.f32 1.442695, %v1074_v53  ;;  %v1086_v55 = vmul.f32 1.442695, %v1075_v24 }
 0x31b   : > { %v1065_v56 = vpop.xlane.xlu1 %1064 }
 0x31c   : > { %1619 = vpow2.f32 %v1084_v54  ;;  %v1076_v57 = vsub.f32 %v1011_v41, %v1065_v56  ;;  %v1077_v58 = vsub.f32 %v1043_v43, %v1065_v56 }
 0x31d   : > { %1621 = vpow2.f32 %v1086_v55 }
 0x31e   : > { %v1088_v59 = vmul.f32 1.442695, %v1076_v57  ;;  %v1090_v60 = vmul.f32 1.442695, %v1077_v58 }
 0x320   : > { %1623 = vpow2.f32 %v1088_v59  ;;  %v1071_v61 = vpop.xlane.xlu0 %1070 }
 0x321   : > { %1625 = vpow2.f32 %v1090_v60  ;;  %v1078_v62 = vsub.f32 %v1012_v25, %v1071_v61  ;;  %v1079_v63 = vsub.f32 %v1044_v21, %v1071_v61 }
 0x322   : > { %v1616_v0 = vpop.eup %1615 }
 0x323   : > { %v1618_v1 = vpop.eup %1617  ;;  %v1092_v2 = vmul.f32 1.442695, %v1078_v62  ;;  %v1094_v3 = vmul.f32 1.442695, %v1079_v63 }
 0x324   : > { %v1096_v5 = vadd.f32 %v1618_v1, %v1616_v0 }
 0x325   : > { %1627 = vpow2.f32 %v1092_v2 }
 0x326   : > { %v1620_v6 = vpop.eup %1619  ;;  %1629 = vpow2.f32 %v1094_v3  ;;  %1097 = vadd.xlane.f32.xlu0 %v1096_v5 }
 0x327   : > { %v1622_v7 = vpop.eup %1621 }
 0x328   : > { %v1099_v4 = vadd.f32 %v1622_v7, %v1620_v6 }
 0x32a   : > { %v1624_v8 = vpop.eup %1623  ;;  %1100 = vadd.xlane.f32.xlu1 %v1099_v4 }
 0x32b   : > { %v1626_v9 = vpop.eup %1625 }
 0x32c   : > { %v1102_v10 = vadd.f32 %v1626_v9, %v1624_v8 }
 0x32e   : > { %1103 = vadd.xlane.f32.xlu0 %v1102_v10 }
 0x32f   : > { %v1628_v11 = vpop.eup %1627 }
 0x330   : > { %v1630_v13 = vpop.eup %1629  ;;  %v1105_v15 = vsel %vm1066_vm0, %v1628_v11, 0.0 }
 0x331   : > { %v1106_v12 = vsel %vm1066_vm0, %v1630_v13, 0.0 }
 0x332   : > { %v1107_v27 = vadd.f32 %v1106_v12, %v1105_v15 }
 0x334   : > { %1108 = vadd.xlane.f32.xlu1 %v1107_v27 }
 0x3b3   : > { %v1098_v18 = vpop.xlane.xlu0 %1097 }
 0x3b4   : > { %1631 = vrcp.f32 %v1098_v18 }
 0x3b7   : > { %v1101_v28 = vpop.xlane.xlu1 %1100 }
 0x3b8   : > { %1633 = vrcp.f32 %v1101_v28 }
 0x3bb   : > { %v1104_v29 = vpop.xlane.xlu0 %1103 }
 0x3bc   : > { %1635 = vrcp.f32 %v1104_v29 }
 0x3be   : > { %v1632_v14 = vpop.eup %1631 }
 0x3bf   : > { %v1114_v19 = vmul.f32 %v1632_v14, %v1616_v0  ;;  %v1115_v30 = vmul.f32 %v1632_v14, %v1618_v1 }
 0x3c1   : > { %1179 = vst [vmem:[%s237_s22] sm:$0xff] %v1114_v19  ;;  %v1109_v31 = vpop.xlane.xlu1 %1108  ;;  %1180 = vst [vmem:[%s237_s22 + $0x8] sm:$0xff] %v1115_v30 }
 0x3c2   : > { %v1634_v32 = vpop.eup %1633  ;;  %1637 = vrcp.f32 %v1109_v31 }
 0x3c3   : > { %v1116_v33 = vmul.f32 %v1634_v32, %v1620_v6  ;;  %v1117_v34 = vmul.f32 %v1634_v32, %v1622_v7 }
 0x3c5   : > { %1181 = vst [vmem:[%s237_s22 + $0x10] sm:$0xff] %v1116_v33  ;;  %v1123_v16 = vpack.c.bf16 %v1117_v34, %v1115_v30  ;;  %1182 = vst [vmem:[%s237_s22 + $0x18] sm:$0xff] %v1117_v34  ;;  %v1122_v35 = vpack.c.bf16 %v1116_v33, %v1114_v19 }
 0x3c6   : > { %v1636_v22 = vpop.eup %1635 }
 0x3c7   : > { %v1118_v36 = vmul.f32 %v1636_v22, %v1624_v8  ;;  %1158 = vmatprep.mubr.bf16.mxu0 %v1123_v16  ;;  %v1119_v37 = vmul.f32 %v1636_v22, %v1626_v9 }
 0x3c8   : > { %1159 = vmatmul.mubr.bf16.vlgmr.msra.gmra.mrb[32].mxu0 %v1122_v35 }
 0x3c9   : > { %1183 = vst [vmem:[%s237_s22 + $0x20] sm:$0xff] %v1118_v36  ;;  %1184 = vst [vmem:[%s237_s22 + $0x28] sm:$0xff] %v1119_v37 }
 0x3cc   : > { %v1638_v17 = vpop.eup %1637 }
 0x3cd   : > { %v1120_v23 = vmul.f32 %v1638_v17, %v1628_v11  ;;  %v1121_v38 = vmul.f32 %v1638_v17, %v1630_v13 }
 0x3cf   : > { %1185 = vst [vmem:[%s237_s22 + $0x30] sm:$0x1] %v1120_v23  ;;  %v1125_v39 = vpack.c.bf16 %v1121_v38, %v1119_v37  ;;  %1186 = vst [vmem:[%s237_s22 + $0x38] sm:$0x1] %v1121_v38  ;;  %v1124_v40 = vpack.c.bf16 %v1120_v23, %v1118_v36 }
 0x3d1   : > { %1166 = vmatprep.mubr.bf16.mxu1 %v1125_v39 }
 0x3d2   : > { %1167 = vmatmul.mubr.bf16.vlgmr.msra.gmra.mrb[32].mxu1 %v1124_v40 }
 0x49b   : > { %v1403_v41 = vpop.f32.mrb[32].mxu0 }
 0x49c   : > { %v1404_v42 = vpop.f32.mrb[33].mxu0 }
 0x49d   : > { %v1405_v20 = vadd.f32 %v1404_v42, %v1403_v41  ;;  %v1406_v43 = vpop.f32.mrb[34].mxu0 }
 0x49e   : > { %v1407_v25 = vpop.f32.mrb[35].mxu0 }
 0x49f   : > { %1175 = vst [vmem:[%s232_s26] sm:$0xff] %v1405_v20  ;;  %v1408_v44 = vadd.f32 %v1407_v25, %v1406_v43 }
 0x4a1   : > { %1176 = vst [vmem:[%s232_s26 + $0x8] sm:$0xff] %v1408_v44 }
 0x4a5   : > { %v1409_v45 = vpop.f32.mrb[32].mxu1 }
 0x4a6   : > { %v1410_v21 = vpop.f32.mrb[33].mxu1 }
 0x4a7   : > { %v1411_v46 = vadd.f32 %v1410_v21, %v1409_v45  ;;  %v1412_v26 = vpop.f32.mrb[34].mxu1 }
 0x4a8   : > { %v1413_v47 = vpop.f32.mrb[35].mxu1 }
 0x4a9   : > { %1177 = vst [vmem:[%s232_s26 + $0x10] sm:$0xff] %v1411_v46  ;;  %v1414_v48 = vadd.f32 %v1413_v47, %v1412_v26 }
 0x4ab   : > { %1178 = vst [vmem:[%s232_s26 + $0x18] sm:$0x1] %v1414_v48 }
 0x4ac PF: > { %s16_s18 = sadd.s32 1, %s1645_s18  }
 0x4ad   : > { %p13_p4 = scmp.ge.s32.totalorder %s16_s18, 4  }
 0x4af   :  { %15 = sbr.rel (!%p13_p4) target bundleno = 1 (0x1), region = 78 }

</bundles_post_ra>
